<compile_context>
chip_gen: v7x
topology: tpu7x:2x2x1
jax: 0.10.0
libtpu: 0.0.40
codegen_flags: <defaults>
</compile_context>

<pallas_src>
import functools

import jax
import jax.numpy as jnp
from jax.experimental import pallas as pl
from jax.experimental.pallas import tpu as pltpu


def _object_model_kernel(sent_ref, rowb_ref, w_ref, out_ref, *, apply_sigmoid):
    """One (bt, St) tile: y = sent @ W_fused + row_bias; optional sigmoid."""
    bt, st, h = sent_ref.shape
    x = sent_ref[...].astype(jnp.bfloat16).reshape(bt * st, h)
    y = jnp.dot(x, w_ref[...], preferred_element_type=jnp.float32)   # (bt*St, Rp)
    y = y.reshape(bt, st, -1) + rowb_ref[...]          # rowb (bt,1,Rp) bcast over St
    if apply_sigmoid:
        y = jax.nn.sigmoid(y)
    out_ref[...] = y


def _largest_divisor(n, cap):
    cap = max(1, min(cap, n))
    for d in range(cap, 0, -1):
        if n % d == 0:
            return d
    return 1


def object_model_forward(sentence_feature, sub_head, sub_tail,
                         w_head, b_head, w_tail, b_tail,
                         sigmoid=False, block_batch=8):
    """sentence_feature: [B, S, H]; sub_head/sub_tail: [B, 1] int.
    w_*: [H, R] (transposed vs. nn.Linear); b_*: [R].
    Returns (obj_head_pred, obj_tail_pred), each [B, S, R] f32."""
    B, S, H = sentence_feature.shape
    R = w_head.shape[1]

    # --- wrapper-side gather of subject head/tail token features (B, H) ---
    hi = jnp.clip(sub_head.reshape(B).astype(jnp.int32), 0, S - 1)
    ti = jnp.clip(sub_tail.reshape(B).astype(jnp.int32), 0, S - 1)
    sf32 = sentence_feature.astype(jnp.float32)
    head_feat = jnp.take_along_axis(sf32, hi[:, None, None], axis=1)[:, 0, :]
    tail_feat = jnp.take_along_axis(sf32, ti[:, None, None], axis=1)[:, 0, :]
    sub_feat = (head_feat + tail_feat) * 0.5                          # (B, H)

    # --- fuse the two heads, pad N to a lane-dense multiple of 128 ---
    Rp = max(128, ((2 * R + 127) // 128) * 128)
    w_fused_f32 = (jnp.zeros((H, Rp), jnp.float32)
                   .at[:, :R].set(w_head.astype(jnp.float32))
                   .at[:, R:2 * R].set(w_tail.astype(jnp.float32)))
    b_fused = (jnp.zeros((Rp,), jnp.float32)
               .at[:R].set(b_head.astype(jnp.float32))
               .at[R:2 * R].set(b_tail.astype(jnp.float32)))

    # Fold the broadcast-add into a per-sentence row bias (f32, tiny matmul).
    row_bias = (sub_feat @ w_fused_f32 + b_fused)[:, None, :]         # (B, 1, Rp)
    w_fused = w_fused_f32.astype(jnp.bfloat16)                        # resident bf16

    # --- tile choice: bt | B (no padding), St | S and a multiple of 8 ---
    bt = _largest_divisor(B, block_batch)
    if S % 8 == 0:
        St = _largest_divisor(S // 8, 512 // 8) * 8    # largest mult-of-8 divisor ≤ 512
    else:
        St = S                                         # full-extent fallback
    # Guarantee >=2 grid steps when possible (v7x has 2 TensorCores).
    if (B // bt) * (S // St) == 1 and B > 1:
        bt = _largest_divisor(B, max(1, B // 2))

    in_bytes = jnp.dtype(sentence_feature.dtype).itemsize
    vmem_need = (2 * bt * St * H * in_bytes            # sent, double-buffered
                 + 2 * bt * St * Rp * 4                # out, double-buffered
                 + 2 * bt * Rp * 4                     # row bias
                 + 2 * H * Rp * 2)                     # bf16 fused weight
    vmem_limit = int(min(64 * 2 ** 20, max(vmem_need + 4 * 2 ** 20, 16 * 2 ** 20)))

    kernel = functools.partial(_object_model_kernel, apply_sigmoid=sigmoid)

    out = pl.pallas_call(
        kernel,
        out_shape=jax.ShapeDtypeStruct((B, S, Rp), jnp.float32),
        grid_spec=pltpu.PrefetchScalarGridSpec(
            num_scalar_prefetch=0,
            grid=(B // bt, S // St),
            in_specs=[
                pl.BlockSpec((bt, St, H), lambda i, j: (i, j, 0)),   # sentence tile
                pl.BlockSpec((bt, 1, Rp), lambda i, j: (i, 0, 0)),   # per-sentence bias
                pl.BlockSpec((H, Rp), lambda i, j: (0, 0)),          # fused weight (resident)
            ],
            out_specs=pl.BlockSpec((bt, St, Rp), lambda i, j: (i, j, 0)),
        ),
        compiler_params=pltpu.CompilerParams(
            dimension_semantics=("parallel", "parallel"),
            vmem_limit_bytes=vmem_limit),
    )(sentence_feature, row_bias, w_fused)

    obj_head_pred = out[:, :, :R]
    obj_tail_pred = out[:, :, R:2 * R]
    return obj_head_pred, obj_tail_pred


def _reference(sentence_feature, sub_head, sub_tail, w_head, b_head, w_tail, b_tail,
               sigmoid=False):
    B, S, _ = sentence_feature.shape
    idx = jnp.arange(B)
    hi = jnp.clip(sub_head.reshape(B), 0, S - 1)
    ti = jnp.clip(sub_tail.reshape(B), 0, S - 1)
    head_feat = sentence_feature[idx, hi]
    tail_feat = sentence_feature[idx, ti]
    sub_feat = (head_feat + tail_feat) / 2.0
    x = sentence_feature + sub_feat[:, None, :]
    h = x @ w_head + b_head
    t = x @ w_tail + b_tail
    if sigmoid:
        h = jax.nn.sigmoid(h)
        t = jax.nn.sigmoid(t)
    return h, t


if __name__ == "__main__":
    # Small shapes consistent with the module (H stands in for 768, R for
    # len(relation2id)).
    B, S, H, R = 4, 8, 256, 16

    key = jax.random.PRNGKey(0)
    k1, k2, k3, k4, k5, k6, k7 = jax.random.split(key, 7)

    sentence_feature = jax.random.normal(k1, (B, S, H), dtype=jnp.float32)
    sub_head = jax.random.randint(k2, (B, 1), 0, S, dtype=jnp.int32)
    sub_tail = jax.random.randint(k3, (B, 1), 0, S, dtype=jnp.int32)

    # Deterministic synthetic parameter init (Linear(H, R) x2, stored [H, R]).
    w_head = jax.random.normal(k4, (H, R), dtype=jnp.float32) * 0.02
    b_head = jax.random.normal(k5, (R,), dtype=jnp.float32) * 0.02
    w_tail = jax.random.normal(k6, (H, R), dtype=jnp.float32) * 0.02
    b_tail = jax.random.normal(k7, (R,), dtype=jnp.float32) * 0.02

    for sig in (False, True):
        obj_head_pred, obj_tail_pred = object_model_forward(
            sentence_feature, sub_head, sub_tail,
            w_head, b_head, w_tail, b_tail, sigmoid=sig)
        jax.block_until_ready((obj_head_pred, obj_tail_pred))

        ref_h, ref_t = _reference(sentence_feature, sub_head, sub_tail,
                                  w_head, b_head, w_tail, b_tail, sigmoid=sig)
        # bf16 MXU operands -> slightly looser tolerance than pure-f32.
        assert jnp.allclose(obj_head_pred, ref_h, atol=1e-2, rtol=1e-2)
        assert jnp.allclose(obj_tail_pred, ref_t, atol=1e-2, rtol=1e-2)

    print("KERNEL_OK")
</pallas_src>

<mosaic_0001>
module attributes {stable_mosaic.version = 11 : i64} {
  func.func @_object_model_kernel(%arg0: i32, %arg1: i32, %arg2: memref<2x8x256xf32, #tpu.memory_space<vmem>>, %arg3: memref<2x1x128xf32, #tpu.memory_space<vmem>>, %arg4: memref<256x128xbf16, #tpu.memory_space<vmem>>, %arg5: memref<2x8x128xf32, #tpu.memory_space<vmem>>) attributes {dimension_semantics = [#tpu.dimension_semantics<parallel>, #tpu.dimension_semantics<parallel>], iteration_bounds = array<i64: 2, 1>, scalar_prefetch = 0 : i64, scratch_operands = 0 : i64, tpu.core_type = #tpu.core_type<tc>, window_params = [{transform_indices = @transform_0, window_bounds = array<i64: 2, 8, 256>}, {transform_indices = @transform_1, window_bounds = array<i64: 2, 1, 128>}, {pipeline_mode = #tpu.pipeline_mode<synchronous>, transform_indices = @transform_2, window_bounds = array<i64: 256, 128>}, {transform_indices = @transform_3, window_bounds = array<i64: 2, 8, 128>}]} {
    %c0 = arith.constant 0 : index
    %c0_0 = arith.constant 0 : index
    %c0_1 = arith.constant 0 : index
    %0 = vector.load %arg2[%c0, %c0_0, %c0_1] : memref<2x8x256xf32, #tpu.memory_space<vmem>>, vector<2x8x256xf32>
    %1 = arith.truncf %0 : vector<2x8x256xf32> to vector<2x8x256xbf16>
    %2 = vector.shape_cast %1 : vector<2x8x256xbf16> to vector<16x256xbf16>
    %c0_2 = arith.constant 0 : index
    %c0_3 = arith.constant 0 : index
    %3 = vector.load %arg4[%c0_2, %c0_3] : memref<256x128xbf16, #tpu.memory_space<vmem>>, vector<256x128xbf16>
    %cst = arith.constant dense<0.000000e+00> : vector<16x128xf32>
    %4 = tpu.matmul %2, %3, %cst {dimension_numbers = #tpu.dot_dimension_numbers<[1], [0], [0], [1], [0, 0, 1, 1], [], []>} : vector<16x256xbf16>, vector<256x128xbf16>, vector<16x128xf32> -> vector<16x128xf32>
    %5 = vector.shape_cast %4 : vector<16x128xf32> to vector<2x8x128xf32>
    %c0_4 = arith.constant 0 : index
    %c0_5 = arith.constant 0 : index
    %c0_6 = arith.constant 0 : index
    %6 = vector.load %arg3[%c0_4, %c0_5, %c0_6] : memref<2x1x128xf32, #tpu.memory_space<vmem>>, vector<2x1x128xf32>
    %7 = vector.broadcast %6 : vector<2x1x128xf32> to vector<2x8x128xf32>
    %8 = arith.addf %5, %7 : vector<2x8x128xf32>
    %c0_7 = arith.constant 0 : index
    %c0_8 = arith.constant 0 : index
    %c0_9 = arith.constant 0 : index
    %9 = vector.load %arg5[%c0_7, %c0_8, %c0_9] : memref<2x8x128xf32, #tpu.memory_space<vmem>>, vector<2x8x128xf32>
    tpu.vector_store %arg5[%c0_7, %c0_8, %c0_9], %8 {strides = array<i32>} : memref<2x8x128xf32, #tpu.memory_space<vmem>>, vector<2x8x128xf32>,
    return
  }
  func.func @transform_0(%arg0: i32, %arg1: i32) -> (i32, i32, i32) {
    %c0_i32 = arith.constant 0 : i32
    %c0_i32_0 = arith.constant 0 : i32
    return %arg0, %arg1, %c0_i32 : i32, i32, i32
  }
  func.func @transform_1(%arg0: i32, %arg1: i32) -> (i32, i32, i32) {
    %c0_i32 = arith.constant 0 : i32
    %c0_i32_0 = arith.constant 0 : i32
    %c0_i32_1 = arith.constant 0 : i32
    return %arg0, %c0_i32, %c0_i32_0 : i32, i32, i32
  }
  func.func @transform_2(%arg0: i32, %arg1: i32) -> (i32, i32) {
    %c0_i32 = arith.constant 0 : i32
    %c0_i32_0 = arith.constant 0 : i32
    %c0_i32_1 = arith.constant 0 : i32
    return %c0_i32, %c0_i32_0 : i32, i32
  }
  func.func @transform_3(%arg0: i32, %arg1: i32) -> (i32, i32, i32) {
    %c0_i32 = arith.constant 0 : i32
    %c0_i32_0 = arith.constant 0 : i32
    return %arg0, %arg1, %c0_i32 : i32, i32, i32
  }
}

</mosaic_0001>

<bundles_post_ra>
// kernel: tpu_custom_call.1
= control target key start
LH: loop header
LB: loop body
LE: loop exit
PB: predicated region body
PF: predicated region fallthrough
CT: control target
= control target key end

     0   :  { %s1264_s0 = inlined_call_operand.hbm [shape: f32[4,8,256], index: 0, kind: input, shape index: {}]   ;;  %s1265_s1 = inlined_call_operand.hbm [shape: f32[4,1,128], index: 1, kind: input, shape index: {}]   ;;  %s1266_s2 = inlined_call_operand.hbm [shape: bf16[256,128], index: 2, kind: input, shape index: {}]   ;;  %s1267_s3 = inlined_call_operand.hbm [shape: f32[4,8,128], index: 3, kind: output, shape index: {}]  }
   0x1   :  { %1272 = sst [smem:[#allocation14_spill]] %s1264_s0 }
   0x2   :  { %1273 = sst [smem:[#allocation15_spill]] %s1266_s2 }
   0x3   :  { %8 = vsyncpa [#allocation3], 0 }
   0x4   :  { %10 = vsyncpa [#allocation3 + $0x1], 0 }
   0x5   :  { %11 = vsyncpa [#allocation6], 0 }
   0x6   :  { %13 = vsyncpa [#allocation6 + $0x1], 0 }
   0x7   :  { %14 = vsyncpa [#allocation4], 0 }
   0x8   :  { %16 = vsyncpa [#allocation4 + $0x1], 0  ;;  %s988_s12 = smov 0   ;;  %s990_s13 = smov 0  }
   0x9   :  { %s992_s14 = smov 0   ;;  %s994_s15 = smov 0  }
   0xa   :  { %s996_s16 = smov 0   ;;  %s998_s17 = smov 0  }
   0xb LB: > { %s1019_s18 = sadd.s32 4294967295, %s955_s17   ;;  %s607_s19 = sadd.s32 4294967294, %s955_s17   ;;  %s955_s17 = sphi %s998_s17, %s22_s17   ;;  %s951_s16 = sphi %s996_s16, %s1297_s16   ;;  %s947_s15 = sphi %s994_s15, %s1296_s15   ;;  %s943_s14 = sphi %s992_s14, %s1295_s14   ;;  %s939_s13 = sphi %s990_s13, %s1294_s13   ;;  %s935_s12 = sphi %s988_s12, %s1293_s12  }
   0xc   : > { %p56_p0 = scmp.ne.s32.totalorder %s939_s13, %s935_s12  ;;  %p1268_p1 = scmp.eq.s32.totalorder %s1019_s18, 0 }
   0xd   : > { %p135_p3 = scmp.eq.s32.totalorder %s607_s19, 1  ;;  %p608_p5 = scmp.ge.s32.totalorder %s955_s17, 1 }
   0xe   : > { %p1028_p4 = por %p1268_p1, %p56_p0  ;;  %p142_p7 = scmp.lt.s32.totalorder %s955_s17, 3 }
   0xf   : > { %p1033_p6 = por %p135_p3, %p56_p0  ;;  %s957_s23 = smov [#allocation7]  }
  0x10   : > { %s1274_s20 = scalar_select %p1028_p4, 1, 0 }
  0x11   : > { %s1275_s21 = scalar_select %p1033_p6, 1, 0 }
  0x12   : > { %p1038_p8 = pnand %p608_p5, %p142_p7  ;;  %s154_s24 = sshll.u32 %s957_s23, 4  ;;  %s155_s24 = int_to_ptr.vmem [resolvable:$true] %s154_s24 }
  0x13   : > { %s34_s26 = sadd.s32 1, %s951_s16  ;;  %s1278_s2 = sld [smem:[#allocation15_spill]] }
  0x14   : > { %s1276_s22 = scalar_select %p1038_p8, 1, 0 }
  0x15   : > { %p686_p9 = pneg %p1038_p8 }
  0x17   : > { %p1047_p11 = pnand %p686_p9, %p1268_p1 }
  0x19   : > { %s777_s29 = scalar_lea.hbm %s1278_s2, 2048  ;;  %p779_p13 = pneg %p1047_p11 }
  0x1a   : > { %p778_p12 = scmp.ne.s32.totalorder %s1278_s2, %s777_s29  ;;  %p784_p5 = scmp.lt.u32.totalorder %s777_s29, %s1278_s2 }
  0x1c   : > { %p780_p0 = pnand %p779_p13, %p778_p12 }
  0x1e   : > { %p781_p3 = pneg %p780_p0 }
  0x20   : > { %p786_p7 = pnand %p784_p5, %p781_p3 }
  0x22   : > { %789 = shalt.err (!%p786_p7)
}
  0x23   : > { %s790_s7 = scalar_lea.vmem %s155_s24, 2048  ;;  %p798_p2 = scmp.lt.s32.totalorder %s155_s24, %s155_s24 }
  0x24   : > { %p791_p9 = scmp.ne.s32.totalorder %s155_s24, %s790_s7  ;;  %p799_p6 = scmp.lt.s32.totalorder %s790_s7, %s790_s7 }
  0x26   : > { %p793_p10 = pnand %p791_p9, %p779_p13  ;;  %p800_p4 = por %p799_p6, %p798_p2 }
  0x28   : > { %p794_p1 = pneg %p793_p10 }
  0x2a   : > { %p801_p8 = pnand %p800_p4, %p794_p1 }
  0x2c   : > { %804 = shalt.err (!%p801_p8)
}
  0x2d   : > { %s958_s8 = smov 64   ;;  %s959_s9 = smov 4  }
  0x2e   : > { %689 = dma.hbm_to_vmem [thread:$0]  (!%p1047_p11), %s1278_s2, 2048, %s155_s24, [#allocation6], %s958_s8, %s958_s8, %s959_s9  }
  0x2f   : > { %p36_p1 = scmp.ge.s32.totalorder %s34_s26, 2  ;;  %s43_s19 = sadd.s32 1, %s943_s14 }
  0x30   : > { %p50_p2 = scmp.ne.s32.totalorder %s943_s14, %s939_s13  ;;  %p51_p4 = scmp.eq.s32.totalorder %s955_s17, 0 }
  0x31   : > { %s1299_s26 = smov (%p36_p1, %s34_s26), 0  ;;  %p1281_p8 = scmp.eq.s32.totalorder %s1019_s18, 1 }
  0x32   : > { %1279 = sst [smem:[#allocation13_spill]] %s1299_s26  ;;  %p1074_p6 = por %p51_p4, %p50_p2 }
  0x33   : > { %p1080_p10 = por %p1281_p8, %p50_p2  ;;  %s38_s27 = ssub.s32 %s951_s16, %s1299_s26 }
  0x34   : > { %p702_p11 = scmp.lt.s32.totalorder %s955_s17, 2  ;;  %p41_p12 = scmp.eq.s32.totalorder %s38_s27, 0 }
  0x35   : > { %s1088_s24 = sand.u32 1, %s943_s14   ;;  %s649_s30 = sshll.u32 %s951_s16, 9 }
  0x36   : > { %s611_s28 = sshll.u32 %s1088_s24, 5  ;;  %s1283_s0 = sld [smem:[#allocation14_spill]] }
  0x37   : > { %s1092_s29 = scalar_select %p41_p12, %s943_s14, %s43_s19  }
  0x38   : > { %s172_s7 = scalar_lea.vmem [#allocation2], %s611_s28  ;;  %p1104_p13 = pnand %p702_p11, %p1074_p6 }
  0x39   : > { %s182_s8 = sshll.u32 %s172_s7, 4  ;;  %s169_s11 = scalar_lea.sflag [#allocation3], %s1088_s24  ;;  %s1100_s8 = int_to_ptr.vmem [resolvable:$true] %s182_s8 }
  0x3a   : > { %p807_p3 = pneg %p1104_p13 }
  0x3c   : > { %s1098_s6 = scalar_lea.hbm %s1283_s0, %s649_s30  ;;  %s810_s23 = scalar_lea.hbm %s1283_s0, 1024 }
  0x3d   : > { %s805_s19 = scalar_lea.hbm %s1098_s6, 512  ;;  %p811_p9 = scmp.lt.u32.totalorder %s1098_s6, %s1283_s0 }
  0x3e   : > { %p806_p0 = scmp.ne.s32.totalorder %s1098_s6, %s805_s19  ;;  %p812_p1 = scmp.lt.u32.totalorder %s810_s23, %s805_s19 }
  0x3f   : > { %p814_p4 = scmp.lt.u32.totalorder %s805_s19, %s1098_s6 }
  0x40   : > { %p808_p5 = pnand %p807_p3, %p806_p0  ;;  %p813_p2 = por %p812_p1, %p811_p9 }
  0x42   : > { %p809_p7 = pneg %p808_p5  ;;  %p815_p6 = por %p814_p4, %p813_p2 }
  0x44   : > { %p816_p8 = pnand %p815_p6, %p809_p7 }
  0x46   : > { %819 = shalt.err (!%p816_p8)
}
  0x47   : > { %s820_s5 = scalar_lea.vmem %s1100_s8, 512  ;;  %s960_s7 = smov [#allocation2]  }
  0x48   : > { %p821_p11 = scmp.ne.s32.totalorder %s1100_s8, %s820_s5  ;;  %s825_s27 = sshll.u32 %s960_s7, 4  ;;  %s826_s27 = int_to_ptr.vmem [resolvable:$false] %s825_s27 }
  0x49   : > { %s827_s28 = scalar_lea.vmem %s826_s27, 1024  ;;  %p828_p5 = scmp.lt.s32.totalorder %s1100_s8, %s826_s27 }
  0x4a   : > { %p823_p12 = pnand %p821_p11, %p807_p3  ;;  %p829_p9 = scmp.lt.s32.totalorder %s827_s28, %s820_s5 }
  0x4c   : > { %p824_p0 = pneg %p823_p12  ;;  %p830_p1 = por %p829_p9, %p828_p5 }
  0x4e   : > { %p831_p2 = pnand %p830_p1, %p824_p0 }
  0x50   : > { %834 = shalt.err (!%p831_p2)
}
  0x51   : > { %s961_s19 = smov 256   ;;  %s962_s23 = smov 16  }
  0x52   : > { %693 = dma.hbm_to_vmem [thread:$0]  (!%p1104_p13), %s1098_s6, 512, %s1100_s8, %s169_s11, %s961_s19, %s961_s19, %s962_s23  }
  0x53   : > { %s615_s30 = sshll.u32 %s1088_s24, 1  ;;  %s650_s4 = sshll.u32 %s951_s16, 5 }
  0x54   : > { %s1143_s27 = scalar_lea.hbm %s1265_s1, %s650_s4  ;;  %s196_s28 = scalar_lea.vmem [#allocation5], %s615_s30 }
  0x55   : > { %s203_s10 = sshll.u32 %s196_s28, 4  ;;  %s1285_s0 = sand.u32 1, %s955_s17   ;;  %s1145_s10 = int_to_ptr.vmem [resolvable:$true] %s203_s10 }
  0x56   : > { %s1149_s2 = scalar_lea.sflag [#allocation6], %s1285_s0  ;;  %s835_s26 = scalar_lea.hbm %s1143_s27, 32 }
  0x57   : > { %p836_p7 = scmp.ne.s32.totalorder %s1143_s27, %s835_s26  ;;  %s840_s8 = scalar_lea.hbm %s1265_s1, 64 }
  0x58   : > { %p841_p8 = scmp.lt.u32.totalorder %s1143_s27, %s1265_s1  ;;  %p842_p11 = scmp.lt.u32.totalorder %s840_s8, %s835_s26 }
  0x59   : > { %p838_p4 = pnand %p836_p7, %p807_p3  ;;  %p844_p0 = scmp.lt.u32.totalorder %s835_s26, %s1143_s27 }
  0x5a   : > { %p843_p12 = por %p842_p11, %p841_p8 }
  0x5b   : > { %p839_p6 = pneg %p838_p4 }
  0x5c   : > { %p845_p5 = por %p844_p0, %p843_p12 }
  0x5e   : > { %p846_p9 = pnand %p845_p5, %p839_p6 }
  0x60   : > { %849 = shalt.err (!%p846_p9)
}
  0x61   : > { %s850_s0 = scalar_lea.vmem %s1145_s10, 32  ;;  %s963_s30 = smov [#allocation5]  }
  0x62   : > { %p851_p1 = scmp.ne.s32.totalorder %s1145_s10, %s850_s0  ;;  %s855_s4 = sshll.u32 %s963_s30, 4  ;;  %s856_s4 = int_to_ptr.vmem [resolvable:$false] %s855_s4 }
  0x63   : > { %s857_s5 = scalar_lea.vmem %s856_s4, 64  ;;  %p858_p4 = scmp.lt.s32.totalorder %s1145_s10, %s856_s4 }
  0x64   : > { %p853_p2 = pnand %p851_p1, %p807_p3  ;;  %p859_p8 = scmp.lt.s32.totalorder %s857_s5, %s850_s0 }
  0x66   : > { %p854_p7 = pneg %p853_p2  ;;  %p860_p11 = por %p859_p8, %p858_p4 }
  0x68   : > { %p861_p12 = pnand %p860_p11, %p854_p7 }
  0x6a   : > { %864 = shalt.err (!%p861_p12)
}
  0x6b   : > { %s964_s26 = smov 1   ;;  %p1286_p3 = scmp.ne.s32.totalorder %s1276_s22, 0 }
  0x6c   : > { %696 = dma.hbm_to_vmem [thread:$0]  (!%p1104_p13), %s1143_s27, 32, %s1145_s10, %s1149_s2, %s962_s23, %s962_s23, %s964_s26  }
  0x6d   : > { %215 = sbr.rel (%p1286_p3) target bundleno = 390 (0x186), region = 32  ;;  %s1180_s7 = sand.u32 (!%p1286_p3), 1, %s939_s13  }
  0x6e   : > { %s619_s28 = sshll.u32 (!%p1286_p3), %s1180_s7, 5  ;;  %s218_s24 = scalar_lea.sflag (!%p1286_p3), [#allocation3], %s1180_s7 }
  0x6f   : > { %s1184_s6 = scalar_lea.vmem (!%p1286_p3), [#allocation2], %s619_s28  ;;  %p1287_p6 = scmp.ne.s32.totalorder (!%p1286_p3), %s1274_s20, 0 }
  0x74   : > { %918 = dma.done.wait (%p1287_p6), %s218_s24, 512  }
  0x75   : > { %920 = vsyncadd (%p1287_p6), %s218_s24, 4294966784  ;;  %s226_s2 = sand.u32 1, %s1019_s18   ;;  %s620_s22 = sshll.u32 %s1180_s7, 1 }
  0x76   : > { %s227_s9 = scalar_lea.sflag [#allocation6], %s226_s2  ;;  %s1192_s10 = scalar_lea.vmem [#allocation5], %s620_s22 }
  0x77   : > { %922 = dma.done.wait (%p1287_p6), %s227_s9, 32  }
  0x78   : > { %924 = vsyncadd (%p1287_p6), %s227_s9, 4294967264  ;;  %p1288_p13 = scmp.eq.s32.totalorder %s1019_s18, 0 }
  0x7a   : > { %926 = dma.done.wait (%p1288_p13), [#allocation6], 2048   ;;  %p1289_p0 = pmov %p1288_p13 }
  0x7b   : > { %v761_v0 = vld [vmem:[#allocation7 + $0x40] sm:$0xff]   ;;  %v763_v2 = vld [vmem:[#allocation7 + $0x48] sm:$0xff]   ;;  %v765_v4 = vld [vmem:[#allocation7 + $0x50] sm:$0xff]   ;;  %s622_s18 = sshll.u32 %s1180_s7, 4  ;;  %s653_s27 = sshll.u32 %s947_s15, 8 }
  0x7c   : > { %928 = vsyncadd (%p1289_p0), [#allocation6], 4294965248  ;;  %v762_v1 = vld [vmem:[#allocation7] sm:$0xff]   ;;  %654 = vmatprep.subr.bf16.mxu0 %v761_v0  ;;  %v764_v3 = vld [vmem:[#allocation7 + $0x8] sm:$0xff]   ;;  %s261_s20 = scalar_lea.vmem [#allocation8], %s622_s18  ;;  %s1215_s19 = scalar_lea.hbm %s1267_s3, %s653_s27 }
  0x7d   : > { %655 = vmatpush3.bf16.msra.mxu0 %v762_v1  ;;  %v766_v5 = vld [vmem:[#allocation7 + $0x10] sm:$0xff]   ;;  %v767_v6 = vld [vmem:[#allocation7 + $0x58] sm:$0xff]   ;;  %v769_v8 = vld [vmem:[#allocation7 + $0x60] sm:$0xff]   ;;  %s488_s23 = sshll.u32 %s261_s20, 4  ;;  %s474_s0 = scalar_lea.sflag [#allocation4], %s1180_s7  ;;  %s1210_s23 = int_to_ptr.vmem [resolvable:$true] %s488_s23 }
  0x7e   : > { %656 = vmatprep.subr.bf16.mxu0 %v763_v2  ;;  %v768_v7 = vld [vmem:[#allocation7 + $0x18] sm:$0xff]   ;;  %v770_v9 = vld [vmem:[#allocation7 + $0x20] sm:$0xff]   ;;  %v771_v10 = vld [vmem:[#allocation7 + $0x68] sm:$0xff]   ;;  %s865_s30 = scalar_lea.vmem %s1210_s23, 256  ;;  %s965_s15 = smov [#allocation8]  }
  0x7f   : > { %v267_v11 = vld [vmem:[%s1184_s6 + $0x8] sm:$0xff]  ;;  %v269_v12 = vld [vmem:[%s1184_s6 + $0x18] sm:$0xff]  ;;  %v266_v19 = vld [vmem:[%s1184_s6] sm:$0xff]  ;;  %p866_p5 = scmp.ne.s32.totalorder %s1210_s23, %s865_s30  ;;  %s869_s4 = sshll.u32 %s965_s15, 4  ;;  %s870_s4 = int_to_ptr.vmem [resolvable:$false] %s869_s4 }
  0x80   : > { %v652_v13 = vpack.c.bf16 %v269_v12, %v267_v11  ;;  %v772_v14 = vld [vmem:[#allocation7 + $0x28] sm:$0xff]   ;;  %v773_v15 = vld [vmem:[#allocation7 + $0x70] sm:$0xff]   ;;  %v775_v17 = vld [vmem:[#allocation7 + $0x78] sm:$0xff]   ;;  %s871_s5 = scalar_lea.vmem %s870_s4, 512  ;;  %p872_p2 = scmp.lt.s32.totalorder %s1210_s23, %s870_s4 }
  0x81   : > { %657 = vmatpush3.bf16.msra.mxu0 %v764_v3  ;;  %v774_v16 = vld [vmem:[#allocation7 + $0x30] sm:$0xff]   ;;  %v776_v18 = vld [vmem:[#allocation7 + $0x38] sm:$0xff]   ;;  %p867_p9 = pnand %p866_p5, %p1080_p10  ;;  %p873_p7 = scmp.lt.s32.totalorder %s871_s5, %s865_s30 }
  0x82   : > { %658 = vmatprep.subr.bf16.mxu0 %v765_v4  ;;  %446 = vmatprep.mubr.bf16.mxu0 %v652_v13  ;;  %v268_v20 = vld [vmem:[%s1184_s6 + $0x10] sm:$0xff]  ;;  %v641_v24 = vld [vmem:[%s1192_s10] ss:$0 sm:$0xff]  ;;  %v642_v28 = vld [vmem:[%s1192_s10 + $0x1] ss:$0 sm:$0xff] }
  0x83   : > { %v651_v21 = vpack.c.bf16 %v268_v20, %v266_v19  ;;  %p868_p1 = pneg %p867_p9  ;;  %p874_p4 = por %p873_p7, %p872_p2 }
  0x85   : > { %659 = vmatpush3.bf16.msra.mxu0 %v766_v5  ;;  %p875_p8 = pnand %p874_p4, %p868_p1 }
  0x86   : > { %660 = vmatprep.subr.bf16.mxu0 %v767_v6 }
  0x89   : > { %661 = vmatpush3.bf16.msra.mxu0 %v768_v7 }
  0x8a   : > { %662 = vmatprep.subr.bf16.mxu0 %v769_v8 }
  0x8d   : > { %663 = vmatpush3.bf16.msra.mxu0 %v770_v9 }
  0x8e   : > { %664 = vmatprep.subr.bf16.mxu0 %v771_v10 }
  0x91   : > { %665 = vmatpush3.bf16.msra.mxu0 %v772_v14 }
  0x92   : > { %666 = vmatprep.subr.bf16.mxu0 %v773_v15 }
  0x95   : > { %667 = vmatpush3.bf16.msra.mxu0 %v774_v16 }
  0x96   : > { %668 = vmatprep.subr.bf16.mxu0 %v775_v17 }
  0x99   : > { %669 = vmatpush3.bf16.msra.mxu0 %v776_v18 }
  0x9c   : > { %447 = vmatmul.mubr.bf16.vlgmr.msra.gmra.mrb[0].mxu0 %v651_v21 }
 0x16f   : > { %v670_v22 = vpop.f32.mrb[0].mxu0 }
 0x170   : > { %v671_v23 = vpop.f32.mrb[1].mxu0 }
 0x171   : > { %v672_v25 = vadd.f32 %v671_v23, %v670_v22  ;;  %v673_v26 = vpop.f32.mrb[2].mxu0 }
 0x172   : > { %v674_v27 = vpop.f32.mrb[3].mxu0 }
 0x173   : > { %v469_v29 = vadd.f32 %v672_v25, %v641_v24  ;;  %v675_v30 = vadd.f32 %v674_v27, %v673_v26 }
 0x175   : > { %471 = vst [vmem:[%s261_s20] sm:$0xff] %v469_v29  ;;  %v470_v31 = vadd.f32 %v675_v30, %v642_v28 }
 0x177   : > { %472 = vst [vmem:[%s261_s20 + $0x8] sm:$0xff] %v470_v31 }
 0x178   : > { %878 = shalt.err (!%p875_p8)
}
 0x179   : > { %s879_s26 = scalar_lea.hbm %s1215_s19, 256  ;;  %s883_s6 = scalar_lea.hbm %s1267_s3, 512 }
 0x17a   : > { %p880_p11 = scmp.ne.s32.totalorder %s1215_s19, %s879_s26  ;;  %p884_p6 = scmp.lt.u32.totalorder %s1215_s19, %s1267_s3 }
 0x17b   : > { %p885_p13 = scmp.lt.u32.totalorder %s883_s6, %s879_s26  ;;  %p887_p5 = scmp.lt.u32.totalorder %s879_s26, %s1215_s19 }
 0x17c   : > { %p881_p12 = pnand %p880_p11, %p1080_p10 }
 0x17d   : > { %p886_p0 = por %p885_p13, %p884_p6 }
 0x17e   : > { %p882_p3 = pneg %p881_p12 }
 0x17f   : > { %p888_p9 = por %p887_p5, %p886_p0 }
 0x181   : > { %p889_p1 = pnand %p888_p9, %p882_p3 }
 0x183   : > { %892 = shalt.err (!%p889_p1)
}
 0x184   : > { %s966_s9 = smov 128   ;;  %s967_s10 = smov 8  }
 0x185   : > { %684 = dma.vmem_to_hbm [thread:$0]  (%p1080_p10), %s1210_s23, 256, %s1215_s19, %s474_s0, %s966_s9, %s966_s9, %s967_s10  }
 0x186 PF: > { %s503_s18 = sand.u32 1, %s935_s12   ;;  %p1290_p2 = scmp.ne.s32.totalorder %s1275_s21, 0 }
 0x187   : > { %p1291_p7 = scmp.ge.s32.totalorder %s955_s17, 2  ;;  %s504_s20 = scalar_lea.sflag [#allocation4], %s503_s18 }
 0x189   : > { %p698_p4 = pnand %p1291_p7, %p1290_p2 }
 0x18b   : > { %930 = dma.done.wait (!%p698_p4), %s504_s20, 256  }
 0x18c   : > { %932 = vsyncadd (!%p698_p4), %s504_s20, 4294967040  ;;  %s22_s17 = sadd.s32 1, %s955_s17   ;;  %s1292_s25 = sld [smem:[#allocation13_spill]] }
 0x18d   : > { %p19_p8 = scmp.ge.s32.totalorder %s22_s17, 4   ;;  %s1293_s12 = smov %s939_s13 }
 0x18e   : > { %s1294_s13 = smov %s943_s14  ;;  %s1295_s14 = smov %s1092_s29 }
 0x18f   : > { %s1296_s15 = smov %s951_s16  ;;  %21 = sbr.rel (!%p19_p8) target bundleno = 11 (0xb), region = 94 }
 0x192   : > { %s1297_s16 = smov %s1292_s25 }
 0x196   :  { %509 = vsyncpa [#allocation3], 1 }
 0x197   :  { %511 = vsyncpa [#allocation3 + $0x1], 1 }
 0x198   :  { %512 = vsyncpa [#allocation6], 1 }
 0x199   :  { %514 = vsyncpa [#allocation6 + $0x1], 1 }
 0x19a   :  { %515 = vsyncpa [#allocation4], 1 }
 0x19b   :  { %517 = vsyncpa [#allocation4 + $0x1], 1 }

</bundles_post_ra>
